<compile_context>
chip_gen: v5e
topology: v5e:2x2
jax: 0.10.0
libtpu: 0.0.40
codegen_flags: <defaults>
</compile_context>

<pallas_src>
import jax
import jax.numpy as jnp
from jax.experimental import pallas as pl
from jax.experimental.pallas import tpu as pltpu


# ----------------------------------------------------------------------------
# Helpers
# ----------------------------------------------------------------------------
def _round_up(x, m):
    return ((x + m - 1) // m) * m


def _pad2(x, rows, cols):
    return jnp.pad(x, ((0, rows - x.shape[0]), (0, cols - x.shape[1])))


def _pick_tiles(n):
    """Generation-aware (tm, tk, n_pad).  v7x has 64 MiB VMEM -> smaller tk."""
    try:
        kind = jax.devices()[0].device_kind.lower()
    except Exception:  # pragma: no cover - defensive
        kind = ""
    tk_cap = 256 if "v7" in kind else 512
    if n <= 512:
        tm, tk = 128, 128
    else:
        tm, tk = 256, tk_cap
    n_pad = _round_up(max(n, 1), max(tm, tk))
    return tm, tk, n_pad


# ----------------------------------------------------------------------------
# Kernel 1: row-tiled projection  P = X @ W   (cheap, O(N*C*C))
# ----------------------------------------------------------------------------
def _proj_kernel(x_ref, w_ref, o_ref):
    o_ref[...] = jnp.dot(
        x_ref[...], w_ref[...], preferred_element_type=jnp.float32
    ).astype(o_ref.dtype)


def _project_call(x, w, tm):
    n_pad, cin = x.shape
    cout = w.shape[1]
    return pl.pallas_call(
        _proj_kernel,
        out_shape=jax.ShapeDtypeStruct((n_pad, cout), jnp.bfloat16),
        grid_spec=pltpu.PrefetchScalarGridSpec(
            num_scalar_prefetch=0,
            grid=(n_pad // tm,),
            in_specs=[
                pl.BlockSpec((tm, cin), lambda i: (i, 0)),
                pl.BlockSpec((cin, cout), lambda i: (0, 0)),
            ],
            out_specs=pl.BlockSpec((tm, cout), lambda i: (i, 0)),
        ),
        compiler_params=pltpu.CompilerParams(
            dimension_semantics=("parallel",),
            vmem_limit_bytes=32 << 20,
        ),
    )(x, w)


# ----------------------------------------------------------------------------
# Kernel 2: one GCN layer, tiled over the dense adjacency
#   acc(i) = sum_k  A[i,k] @ P[k]          (bf16 MXU, f32 accumulate)
#   out(i) = (relu(acc(i) + b)) @ W_next + b_next      (fused epilogue)
# ----------------------------------------------------------------------------
def _gcn_layer_kernel(a_ref, p_ref, b_ref, wn_ref, bn_ref, o_ref, acc_ref):
    k = pl.program_id(1)

    @pl.when(k == 0)
    def _():
        acc_ref[...] = jnp.zeros_like(acc_ref)

    acc_ref[...] += jnp.dot(
        a_ref[...], p_ref[...], preferred_element_type=jnp.float32
    )

    @pl.when(k == pl.num_programs(1) - 1)
    def _():
        h = jnp.maximum(acc_ref[...] + b_ref[...], 0.0)          # f32 epilogue
        o_ref[...] = (
            jnp.dot(h.astype(wn_ref.dtype), wn_ref[...],
                    preferred_element_type=jnp.float32)
            + bn_ref[...]
        ).astype(o_ref.dtype)


def _gcn_layer_call(a, p, b, wn, bn, tm, tk, out_dtype):
    n_pad = a.shape[0]
    c = p.shape[1]
    cn = wn.shape[1]
    grid = (n_pad // tm, n_pad // tk)
    out_isz = 2 if out_dtype == jnp.bfloat16 else 4

    # VMEM sized to what this call actually keeps resident (double-buffered
    # streamed tiles + resident weights + f32 accumulator), with headroom.
    tile_bytes = (
        2 * tm * tk * 2          # A tile (bf16), double buffered
        + 2 * tk * c * 2         # P tile (bf16), double buffered
        + c * cn * 2             # W_next (bf16), resident
        + (c + cn) * 4           # biases (f32)
        + 2 * tm * cn * out_isz  # out tile, double buffered
        + tm * c * 4             # f32 accumulator scratch
    )
    vmem_limit = int(min(max(2 * tile_bytes, 32 << 20), 100 << 20))

    flops = 2 * n_pad * n_pad * c + 2 * n_pad * c * cn
    bytes_accessed = int(
        n_pad * n_pad * 2              # A streamed once
        + grid[0] * n_pad * c * 2      # P re-streamed per row tile
        + c * cn * 2 + (c + cn) * 4    # weights + biases
        + n_pad * cn * out_isz         # output
    )

    return pl.pallas_call(
        _gcn_layer_kernel,
        out_shape=jax.ShapeDtypeStruct((n_pad, cn), out_dtype),
        grid_spec=pltpu.PrefetchScalarGridSpec(
            num_scalar_prefetch=0,
            grid=grid,
            in_specs=[
                pl.BlockSpec((tm, tk), lambda i, k: (i, k)),   # A_hat tile
                pl.BlockSpec((tk, c), lambda i, k: (k, 0)),    # projected feats
                pl.BlockSpec((1, c), lambda i, k: (0, 0)),     # this layer bias
                pl.BlockSpec((c, cn), lambda i, k: (0, 0)),    # next-layer W
                pl.BlockSpec((1, cn), lambda i, k: (0, 0)),    # next-layer bias
            ],
            out_specs=pl.BlockSpec((tm, cn), lambda i, k: (i, 0)),
            scratch_shapes=[pltpu.VMEM((tm, c), jnp.float32)],
        ),
        compiler_params=pltpu.CompilerParams(
            dimension_semantics=("parallel", "arbitrary"),
            vmem_limit_bytes=vmem_limit,
        ),
        cost_estimate=pl.CostEstimate(
            flops=flops, transcendentals=0, bytes_accessed=bytes_accessed
        ),
    )(a, p, b, wn, bn)


# ----------------------------------------------------------------------------
# Glue: dense symmetrically-normalized adjacency (GCNConv semantics)
# ----------------------------------------------------------------------------
def build_gcn_adjacency(edge_index, num_nodes):
    src, dst = edge_index[0], edge_index[1]
    a = jnp.zeros((num_nodes, num_nodes), dtype=jnp.float32)
    # messages flow src -> dst; duplicate edges accumulate (PyG semantics)
    a = a.at[dst, src].add(1.0)
    # add_remaining_self_loops: only where the diagonal is still zero
    diag = jnp.diag(a)
    a = a + jnp.diag(jnp.where(diag == 0.0, 1.0, 0.0))
    deg = jnp.sum(a, axis=1)
    dinv_sqrt = jnp.where(deg > 0, 1.0 / jnp.sqrt(deg), 0.0)
    return dinv_sqrt[:, None] * a * dinv_sqrt[None, :]


# ----------------------------------------------------------------------------
# Forward pass wrapper
# ----------------------------------------------------------------------------
def anomaly_anticipation_forward(x, edge_index, params):
    n, c_in = x.shape
    a_hat = build_gcn_adjacency(edge_index, n)            # f32 (n, n)

    # Fold fc1 + fc2 (no nonlinearity between): one matmul, one bias.
    wf = params["wf1"] @ params["wf2"]                    # (C_out, 1)
    bf = params["bf1"] @ params["wf2"] + params["bf2"]    # (1, 1)

    c1 = params["w1"].shape[1]
    c2 = params["w2"].shape[1]
    c3 = params["w3"].shape[1]

    cin_p = _round_up(c_in, 128)
    c1_p = _round_up(c1, 128)      # 300 -> 384
    c2_p = _round_up(c2, 128)      # 100 -> 128
    c3_p = _round_up(c3, 128)      # C_out -> 128
    cf_p = 128                     # lane-dense final slab (col 0 is the answer)

    tm, tk, n_pad = _pick_tiles(n)

    # bf16 MXU operands (f32 accumulation in-kernel), f32 biases.
    a_p = _pad2(a_hat, n_pad, n_pad).astype(jnp.bfloat16)
    x_p = _pad2(x, n_pad, cin_p).astype(jnp.bfloat16)
    w1_p = _pad2(params["w1"], cin_p, c1_p).astype(jnp.bfloat16)
    w2_p = _pad2(params["w2"], c1_p, c2_p).astype(jnp.bfloat16)
    w3_p = _pad2(params["w3"], c2_p, c3_p).astype(jnp.bfloat16)
    wf_p = _pad2(wf, c3_p, cf_p).astype(jnp.bfloat16)
    b1_p = _pad2(params["b1"], 1, c1_p).astype(jnp.float32)
    b2_p = _pad2(params["b2"], 1, c2_p).astype(jnp.float32)
    b3_p = _pad2(params["b3"], 1, c3_p).astype(jnp.float32)
    bf_p = _pad2(bf, 1, cf_p).astype(jnp.float32)
    zero2 = jnp.zeros((1, c2_p), jnp.float32)
    zero3 = jnp.zeros((1, c3_p), jnp.float32)

    # P1 = X @ W1                      (separate cheap projection kernel)
    p1 = _project_call(x_p, w1_p, tm)
    # conv1 (+ fused projection into conv2): P2 = relu(A @ P1 + b1) @ W2
    p2 = _gcn_layer_call(a_p, p1, b1_p, w2_p, zero2, tm, tk, jnp.bfloat16)
    # conv2 (+ fused projection into conv3): P3 = relu(A @ P2 + b2) @ W3
    p3 = _gcn_layer_call(a_p, p2, b2_p, w3_p, zero3, tm, tk, jnp.bfloat16)
    # conv3 (+ fused folded fc head):   OUT = relu(A @ P3 + b3) @ Wf + bf
    out = _gcn_layer_call(a_p, p3, b3_p, wf_p, bf_p, tm, tk, jnp.float32)

    return out[:n, :1]


# ----------------------------------------------------------------------------
# Params + pure-JAX f32 reference
# ----------------------------------------------------------------------------
def init_params(key, in_channels, out_channels):
    ks = jax.random.split(key, 5)

    def glorot(k, fan_in, fan_out):
        lim = jnp.sqrt(6.0 / (fan_in + fan_out))
        return jax.random.uniform(k, (fan_in, fan_out), jnp.float32, -lim, lim)

    return {
        "w1": glorot(ks[0], in_channels, 300),
        "b1": jnp.zeros((1, 300), jnp.float32),
        "w2": glorot(ks[1], 300, 100),
        "b2": jnp.zeros((1, 100), jnp.float32),
        "w3": glorot(ks[2], 100, out_channels),
        "b3": jnp.zeros((1, out_channels), jnp.float32),
        "wf1": glorot(ks[3], out_channels, 16),
        "bf1": jnp.zeros((1, 16), jnp.float32),
        "wf2": glorot(ks[4], 16, 1),
        "bf2": jnp.zeros((1, 1), jnp.float32),
    }


def reference_forward(a_hat, x, p):
    h = jnp.maximum(a_hat @ (x @ p["w1"]) + p["b1"], 0.0)
    h = jnp.maximum(a_hat @ (h @ p["w2"]) + p["b2"], 0.0)
    h = jnp.maximum(a_hat @ (h @ p["w3"]) + p["b3"], 0.0)
    h = h @ p["wf1"] + p["bf1"]
    h = h @ p["wf2"] + p["bf2"]
    return h


if __name__ == "__main__":
    key = jax.random.PRNGKey(0)
    k_x, k_p = jax.random.split(key)

    num_nodes = 8
    in_channels = 4
    out_channels = 8

    x = jax.random.normal(k_x, (num_nodes, in_channels), dtype=jnp.float32)

    # small bidirectional ring graph, edge_index shape [2, E]
    src = jnp.arange(num_nodes, dtype=jnp.int32)
    dst = (src + 1) % num_nodes
    edge_index = jnp.stack(
        [jnp.concatenate([src, dst]), jnp.concatenate([dst, src])], axis=0
    )

    params = init_params(k_p, in_channels, out_channels)

    out = anomaly_anticipation_forward(x, edge_index, params)
    out = jax.block_until_ready(out)

    a_hat = build_gcn_adjacency(edge_index, num_nodes)
    ref = reference_forward(a_hat, x, params)

    assert out.shape == (num_nodes, 1)
    # bf16 MXU operands with f32 accumulation -> loosened tolerance vs f32 ref.
    max_err = float(jnp.max(jnp.abs(out - ref)))
    assert jnp.allclose(out, ref, atol=2e-2, rtol=2e-2), f"max abs err {max_err}"

    print("KERNEL_OK")
</pallas_src>

<mosaic_0001>
module attributes {stable_mosaic.version = 11 : i64} {
  func.func @_proj_kernel(%arg0: i32, %arg1: memref<128x128xbf16, #tpu.memory_space<vmem>>, %arg2: memref<128x384xbf16, #tpu.memory_space<vmem>>, %arg3: memref<128x384xbf16, #tpu.memory_space<vmem>>) attributes {dimension_semantics = [#tpu.dimension_semantics<parallel>], iteration_bounds = array<i64: 1>, scalar_prefetch = 0 : i64, scratch_operands = 0 : i64, tpu.core_type = #tpu.core_type<tc>, window_params = [{transform_indices = @transform_0, window_bounds = array<i64: 128, 128>}, {pipeline_mode = #tpu.pipeline_mode<synchronous>, transform_indices = @transform_1, window_bounds = array<i64: 128, 384>}, {transform_indices = @transform_2, window_bounds = array<i64: 128, 384>}]} {
    %c0 = arith.constant 0 : index
    %c0_0 = arith.constant 0 : index
    %0 = vector.load %arg1[%c0, %c0_0] : memref<128x128xbf16, #tpu.memory_space<vmem>>, vector<128x128xbf16>
    %c0_1 = arith.constant 0 : index
    %c0_2 = arith.constant 0 : index
    %1 = vector.load %arg2[%c0_1, %c0_2] : memref<128x384xbf16, #tpu.memory_space<vmem>>, vector<128x384xbf16>
    %cst = arith.constant dense<0.000000e+00> : vector<128x384xf32>
    %2 = tpu.matmul %0, %1, %cst {dimension_numbers = #tpu.dot_dimension_numbers<[1], [0], [0], [1], [0, 0, 1, 1], [], []>} : vector<128x128xbf16>, vector<128x384xbf16>, vector<128x384xf32> -> vector<128x384xf32>
    %3 = arith.truncf %2 : vector<128x384xf32> to vector<128x384xbf16>
    %c0_3 = arith.constant 0 : index
    %c0_4 = arith.constant 0 : index
    %4 = vector.load %arg3[%c0_3, %c0_4] : memref<128x384xbf16, #tpu.memory_space<vmem>>, vector<128x384xbf16>
    tpu.vector_store %arg3[%c0_3, %c0_4], %3 {strides = array<i32>} : memref<128x384xbf16, #tpu.memory_space<vmem>>, vector<128x384xbf16>,
    return
  }
  func.func @transform_0(%arg0: i32) -> (i32, i32) {
    %c0_i32 = arith.constant 0 : i32
    %c0_i32_0 = arith.constant 0 : i32
    return %arg0, %c0_i32 : i32, i32
  }
  func.func @transform_1(%arg0: i32) -> (i32, i32) {
    %c0_i32 = arith.constant 0 : i32
    %c0_i32_0 = arith.constant 0 : i32
    %c0_i32_1 = arith.constant 0 : i32
    return %c0_i32, %c0_i32_0 : i32, i32
  }
  func.func @transform_2(%arg0: i32) -> (i32, i32) {
    %c0_i32 = arith.constant 0 : i32
    %c0_i32_0 = arith.constant 0 : i32
    return %arg0, %c0_i32 : i32, i32
  }
}

</mosaic_0001>

<bundles_post_ra>
// kernel: tpu_custom_call.1
= control target key start
LH: loop header
LB: loop body
LE: loop exit
PB: predicated region body
PF: predicated region fallthrough
CT: control target
= control target key end

     0   :  { %7 = vsyncpa [#allocation3], 0  ;;  %s845_s0 = inlined_call_operand.hbm [shape: bf16[128,128], index: 0, kind: input, shape index: {}]   ;;  %s846_s1 = inlined_call_operand.hbm [shape: bf16[128,384], index: 1, kind: input, shape index: {}]   ;;  %s847_s2 = inlined_call_operand.hbm [shape: bf16[128,384], index: 2, kind: output, shape index: {}]  }
   0x1   :  { %8 = vsyncpa [#allocation6], 0 }
   0x2   :  { %9 = vsyncpa [#allocation4], 0  ;;  %s14_s11 = sshll.u32 %s845_s0, 4  ;;  %s768_s12 = smov [#allocation2]   ;;  %s15_s11 = int_to_ptr.hbm [resolvable:$true] %s14_s11 }
   0x3   :  { %s16_s13 = sshll.u32 %s768_s12, 4  ;;  %s27_s16 = sshll.u32 %s846_s1, 4  ;;  %s17_s13 = int_to_ptr.vmem [resolvable:$true] %s16_s13  ;;  %s28_s16 = int_to_ptr.hbm [resolvable:$true] %s27_s16 }
   0x4   :  { %s769_s17 = smov 64   ;;  %s770_s18 = smov 4  }
   0x5   :  { %22 = dma.hbm_to_vmem [thread:$0]  %s15_s11, 1024, %s17_s13, [#allocation3], %s769_s17, %s769_s17, %s770_s18  }
   0x6   :  { %s771_s19 = smov [#allocation5]   ;;  %s772_s21 = smov 192  }
   0x7   :  { %s29_s20 = sshll.u32 %s771_s19, 4  ;;  %s773_s22 = smov 12   ;;  %s30_s20 = int_to_ptr.vmem [resolvable:$true] %s29_s20 }
   0x8   :  { %35 = dma.hbm_to_vmem [thread:$0]  %s28_s16, 3072, %s30_s20, [#allocation6], %s772_s21, %s772_s21, %s773_s22  }
   0x9   :  { %762 = dma.done.wait [#allocation3], 1024  }
   0xa   :  { %763 = vsyncadd [#allocation3], 4294966272 }
   0xb   :  { %764 = dma.done.wait [#allocation6], 3072  }
   0xc   :  { %765 = vsyncadd [#allocation6], 4294964224  ;;  %v617_v0 = vld [vmem:[#allocation5 + $0xa8] sm:$0xf]  ;;  %v657_v1 = vld [vmem:[#allocation5 + $0xb0] sm:$0xf0] }
   0xd   :  { %v656_v2 = vld [vmem:[#allocation5 + $0xac] sm:$0xf]  ;;  %v618_v3 = vor.u32 %v657_v1, %v617_v0  ;;  %v619_v4 = vld [vmem:[#allocation5 + $0xb4] sm:$0xf0]  ;;  %v625_v5 = vld [vmem:[#allocation5 + $0xb0] sm:$0xf] }
   0xe   :  { %v658_v6 = vld [vmem:[#allocation5 + $0xb8] sm:$0xf0]  ;;  %v799_v7 = vor.u32 %v656_v2, %v619_v4  ;;  %v605_v9 = vld [vmem:[#allocation5 + $0x90] sm:$0xf]  ;;  %v653_v11 = vld [vmem:[#allocation5 + $0x94] sm:$0xf] }
   0xf   :  { %v801_v8 = vor.u32 %v658_v6, %v625_v5  ;;  %v654_v10 = vld [vmem:[#allocation5 + $0x98] sm:$0xf0]  ;;  %268 = vmatpush.bf16.msra.mxu0 %v618_v3  ;;  %659 = vmatpush.bf16.msra.mxu3 %v618_v3  ;;  %v607_v13 = vld [vmem:[#allocation5 + $0x9c] sm:$0xf0]  ;;  %v613_v14 = vld [vmem:[#allocation5 + $0x98] sm:$0xf] }
  0x10   :  { %v606_v12 = vor.u32 %v654_v10, %v605_v9  ;;  %v655_v15 = vld [vmem:[#allocation5 + $0xa0] sm:$0xf0]  ;;  %317 = vmatpush.bf16.msra.mxu1 %v799_v7  ;;  %v805_v16 = vor.u32 %v653_v11, %v607_v13  ;;  %v593_v18 = vld [vmem:[#allocation5 + $0x78] sm:$0xf]  ;;  %v650_v20 = vld [vmem:[#allocation5 + $0x7c] sm:$0xf] }
  0x11   :  { %366 = vmatpush.bf16.msra.mxu2 %v801_v8  ;;  %v807_v17 = vor.u32 %v655_v15, %v613_v14  ;;  %v651_v19 = vld [vmem:[#allocation5 + $0x80] sm:$0xf0]  ;;  %v595_v21 = vld [vmem:[#allocation5 + $0x84] sm:$0xf0]  ;;  %v601_v22 = vld [vmem:[#allocation5 + $0x80] sm:$0xf] }
  0x12   :  { %v652_v23 = vld [vmem:[#allocation5 + $0x88] sm:$0xf0]  ;;  %v594_v24 = vor.u32 %v651_v19, %v593_v18  ;;  %v811_v25 = vor.u32 %v650_v20, %v595_v21  ;;  %v581_v27 = vld [vmem:[#allocation5 + $0x60] sm:$0xf]  ;;  %v647_v29 = vld [vmem:[#allocation5 + $0x64] sm:$0xf] }
  0x13   :  { %269 = vmatpush.bf16.msra.mxu0 %v606_v12  ;;  %660 = vmatpush.bf16.msra.mxu3 %v606_v12  ;;  %v813_v26 = vor.u32 %v652_v23, %v601_v22  ;;  %v648_v28 = vld [vmem:[#allocation5 + $0x68] sm:$0xf0]  ;;  %v583_v30 = vld [vmem:[#allocation5 + $0x6c] sm:$0xf0]  ;;  %v589_v31 = vld [vmem:[#allocation5 + $0x68] sm:$0xf] }
  0x14   :  { %318 = vmatpush.bf16.msra.mxu1 %v805_v16  ;;  %v649_v32 = vld [vmem:[#allocation5 + $0x70] sm:$0xf0]  ;;  %v582_v33 = vor.u32 %v648_v28, %v581_v27  ;;  %v817_v34 = vor.u32 %v647_v29, %v583_v30  ;;  %v569_v36 = vld [vmem:[#allocation5 + $0x48] sm:$0xf]  ;;  %v644_v38 = vld [vmem:[#allocation5 + $0x4c] sm:$0xf] }
  0x15   :  { %367 = vmatpush.bf16.msra.mxu2 %v807_v17  ;;  %v819_v35 = vor.u32 %v649_v32, %v589_v31  ;;  %v645_v37 = vld [vmem:[#allocation5 + $0x50] sm:$0xf0]  ;;  %v571_v39 = vld [vmem:[#allocation5 + $0x54] sm:$0xf0]  ;;  %v577_v40 = vld [vmem:[#allocation5 + $0x50] sm:$0xf] }
  0x16   :  { %v646_v41 = vld [vmem:[#allocation5 + $0x58] sm:$0xf0]  ;;  %v570_v42 = vor.u32 %v645_v37, %v569_v36  ;;  %v574_v43 = vor.u32 %v644_v38, %v571_v39  ;;  %v557_v45 = vld [vmem:[#allocation5 + $0x30] sm:$0xf]  ;;  %v641_v47 = vld [vmem:[#allocation5 + $0x34] sm:$0xf] }
  0x17   :  { %270 = vmatpush.bf16.msra.mxu0 %v594_v24  ;;  %661 = vmatpush.bf16.msra.mxu3 %v594_v24  ;;  %v823_v44 = vor.u32 %v646_v41, %v577_v40  ;;  %v642_v46 = vld [vmem:[#allocation5 + $0x38] sm:$0xf0]  ;;  %v559_v48 = vld [vmem:[#allocation5 + $0x3c] sm:$0xf0]  ;;  %v565_v49 = vld [vmem:[#allocation5 + $0x38] sm:$0xf] }
  0x18   :  { %319 = vmatpush.bf16.msra.mxu1 %v811_v25  ;;  %v643_v50 = vld [vmem:[#allocation5 + $0x40] sm:$0xf0]  ;;  %v558_v51 = vor.u32 %v642_v46, %v557_v45  ;;  %v562_v52 = vor.u32 %v641_v47, %v559_v48  ;;  %v545_v54 = vld [vmem:[#allocation5 + $0x18] sm:$0xf]  ;;  %v638_v56 = vld [vmem:[#allocation5 + $0x1c] sm:$0xf] }
  0x19   :  { %368 = vmatpush.bf16.msra.mxu2 %v813_v26  ;;  %v826_v53 = vor.u32 %v643_v50, %v565_v49  ;;  %v639_v55 = vld [vmem:[#allocation5 + $0x20] sm:$0xf0]  ;;  %v547_v57 = vld [vmem:[#allocation5 + $0x24] sm:$0xf0]  ;;  %v553_v58 = vld [vmem:[#allocation5 + $0x20] sm:$0xf] }
  0x1a   :  { %v640_v59 = vld [vmem:[#allocation5 + $0x28] sm:$0xf0]  ;;  %v546_v60 = vor.u32 %v639_v55, %v545_v54  ;;  %v550_v61 = vor.u32 %v638_v56, %v547_v57  ;;  %v533_v63 = vld [vmem:[#allocation5] sm:$0xf]  ;;  %v635_v1 = vld [vmem:[#allocation5 + $0x4] sm:$0xf] }
  0x1b   :  { %271 = vmatpush.bf16.msra.mxu0 %v582_v33  ;;  %662 = vmatpush.bf16.msra.mxu3 %v582_v33  ;;  %v554_v62 = vor.u32 %v640_v59, %v553_v58  ;;  %v636_v0 = vld [vmem:[#allocation5 + $0x8] sm:$0xf0]  ;;  %v535_v2 = vld [vmem:[#allocation5 + $0xc] sm:$0xf0]  ;;  %v541_v3 = vld [vmem:[#allocation5 + $0x8] sm:$0xf] }
  0x1c   :  { %320 = vmatpush.bf16.msra.mxu1 %v817_v34  ;;  %v637_v4 = vld [vmem:[#allocation5 + $0x10] sm:$0xf0]  ;;  %v534_v5 = vor.u32 %v636_v0, %v533_v63  ;;  %v538_v6 = vor.u32 %v635_v1, %v535_v2  ;;  %v627_v10 = vld [vmem:[#allocation2] sm:$0xff]  ;;  %v628_v12 = vld [vmem:[#allocation2 + $0x8] sm:$0xff]  ;;  %s774_s0 = smov [#allocation7]   ;;  %s485_s25 = sshll.u32 %s847_s2, 4  ;;  %s486_s25 = int_to_ptr.hbm [resolvable:$true] %s485_s25 }
  0x1d   :  { %369 = vmatpush.bf16.msra.mxu2 %v819_v35  ;;  %v542_v9 = vor.u32 %v637_v4, %v541_v3  ;;  %v633_v11 = vld [vmem:[#allocation2 + $0x30] sm:$0xff]  ;;  %v634_v13 = vld [vmem:[#allocation2 + $0x38] sm:$0xff]  ;;  %v632_v15 = vld [vmem:[#allocation2 + $0x28] sm:$0xff]  ;;  %s483_s1 = sshll.u32 %s774_s0, 4  ;;  %s484_s1 = int_to_ptr.vmem [resolvable:$true] %s483_s1 }
  0x1e   :  { %v630_v14 = vld [vmem:[#allocation2 + $0x18] sm:$0xff] }
  0x1f   :  { %272 = vmatpush.bf16.msra.mxu0 %v570_v42  ;;  %663 = vmatpush.bf16.msra.mxu3 %v570_v42 }
  0x20   :  { %321 = vmatpush.bf16.msra.mxu1 %v574_v43 }
  0x21   :  { %370 = vmatpush.bf16.msra.mxu2 %v823_v44 }
  0x23   :  { %273 = vmatpush.bf16.msra.mxu0 %v558_v51  ;;  %664 = vmatpush.bf16.msra.mxu3 %v558_v51 }
  0x24   :  { %322 = vmatpush.bf16.msra.mxu1 %v562_v52 }
  0x25   :  { %371 = vmatpush.bf16.msra.mxu2 %v826_v53 }
  0x27   :  { %274 = vmatpush.bf16.msra.mxu0 %v546_v60  ;;  %665 = vmatpush.bf16.msra.mxu3 %v546_v60 }
  0x28   :  { %323 = vmatpush.bf16.msra.mxu1 %v550_v61 }
  0x29   :  { %372 = vmatpush.bf16.msra.mxu2 %v554_v62 }
  0x2b   :  { %275 = vmatpush.bf16.msra.mxu0 %v534_v5  ;;  %666 = vmatpush.bf16.msra.mxu3 %v534_v5 }
  0x2c   :  { %324 = vmatpush.bf16.msra.mxu1 %v538_v6 }
  0x2d   :  { %373 = vmatpush.bf16.msra.mxu2 %v542_v9 }
  0x2e   :  { %276 = vmatmul.bf16.vlgmr.msra.gmra.mxu0 %v627_v10  ;;  %306 = vmatmul.bf16.vlgmr.msra.gmra.mxu3 %v633_v11 }
  0x2f   :  { %667 = vmatpush.bf16.msrb.mxu3 %v799_v7  ;;  %325 = vmatmul.bf16.vlgmr.msra.gmra.mxu1 %v627_v10  ;;  %v629_v7 = vld [vmem:[#allocation2 + $0x10] sm:$0xff] }
  0x30   :  { %374 = vmatmul.bf16.vlgmr.msra.gmra.mxu2 %v627_v10 }
  0x33   :  { %668 = vmatpush.bf16.msrb.mxu3 %v805_v16 }
  0x37   :  { %669 = vmatpush.bf16.msrb.mxu3 %v811_v25 }
  0x3b   :  { %670 = vmatpush.bf16.msrb.mxu3 %v817_v34 }
  0x3e   :  { %281 = vmatmul.bf16.gmra.mxu0 %v628_v12  ;;  %311 = vmatmul.bf16.gmra.mxu3 %v634_v13 }
  0x3f   :  { %671 = vmatpush.bf16.msrb.mxu3 %v574_v43  ;;  %330 = vmatmul.bf16.gmra.mxu1 %v628_v12 }
  0x40   :  { %379 = vmatmul.bf16.gmra.mxu2 %v628_v12 }
  0x43   :  { %672 = vmatpush.bf16.msrb.mxu3 %v562_v52 }
  0x47   :  { %673 = vmatpush.bf16.msrb.mxu3 %v550_v61 }
  0x4b   :  { %674 = vmatpush.bf16.msrb.mxu3 %v538_v6 }
  0x4e   :  { %286 = vmatmul.bf16.gmra.mxu0 %v629_v7  ;;  %355 = vmatmul.bf16.vlgmr.msrb.gmra.mxu3 %v633_v11 }
  0x4f   :  { %675 = vmatpush.bf16.msra.mxu3 %v801_v8  ;;  %335 = vmatmul.bf16.gmra.mxu1 %v629_v7  ;;  %v631_v8 = vld [vmem:[#allocation2 + $0x20] sm:$0xff] }
  0x50   :  { %384 = vmatmul.bf16.gmra.mxu2 %v629_v7 }
  0x53   :  { %676 = vmatpush.bf16.msra.mxu3 %v807_v17 }
  0x57   :  { %677 = vmatpush.bf16.msra.mxu3 %v813_v26 }
  0x5b   :  { %678 = vmatpush.bf16.msra.mxu3 %v819_v35 }
  0x5e   :  { %291 = vmatmul.bf16.gmra.mxu0 %v630_v14  ;;  %360 = vmatmul.bf16.gmra.mxu3 %v634_v13 }
  0x5f   :  { %679 = vmatpush.bf16.msra.mxu3 %v823_v44  ;;  %340 = vmatmul.bf16.gmra.mxu1 %v630_v14 }
  0x60   :  { %389 = vmatmul.bf16.gmra.mxu2 %v630_v14 }
  0x63   :  { %680 = vmatpush.bf16.msra.mxu3 %v826_v53 }
  0x67   :  { %681 = vmatpush.bf16.msra.mxu3 %v554_v62 }
  0x6b   :  { %682 = vmatpush.bf16.msra.mxu3 %v542_v9 }
  0x6e   :  { %296 = vmatmul.bf16.gmra.mxu0 %v631_v8  ;;  %404 = vmatmul.bf16.vlgmr.msra.gmra.mxu3 %v633_v11 }
  0x6f   :  { %345 = vmatmul.bf16.gmra.mxu1 %v631_v8 }
  0x70   :  { %394 = vmatmul.bf16.gmra.mxu2 %v631_v8 }
  0x7e   :  { %301 = vmatmul.bf16.gmra.mxu0 %v632_v15  ;;  %409 = vmatmul.bf16.gmra.mxu3 %v634_v13 }
  0x7f   :  { %350 = vmatmul.bf16.gmra.mxu1 %v632_v15 }
  0x80   :  { %399 = vmatmul.bf16.gmra.mxu2 %v632_v15 }
  0xab   :  { %v277_v16 = vpop.f32.mrf.mxu0 }
  0xac   :  { %v326_v17 = vpop.f32.mrf.mxu1 }
  0xad   :  { %v415_v18 = vpack.c.bf16 %v326_v17, %v277_v16 }
  0xaf   :  { %447 = vst [vmem:[#allocation7] sm:$0xff] %v415_v18 }
  0xb1   :  { %v307_v19 = vpop.f32.mrf.mxu3 }
  0xb3   :  { %v375_v20 = vpop.f32.mrf.mxu2  ;;  %v279_v22 = vpop.f32.mrf.mxu0 }
  0xb4   :  { %v416_v21 = vpack.c.bf16 %v375_v20, %v375_v20  ;;  %v328_v23 = vpop.f32.mrf.mxu1 }
  0xb5   :  { %v417_v24 = vpack.c.bf16 %v328_v23, %v279_v22 }
  0xb6   :  { %448 = vst [vmem:[#allocation7 + $0x8] sm:$0xf] %v416_v21 }
  0xb7   :  { %449 = vst [vmem:[#allocation7 + $0xc] sm:$0xff] %v417_v24 }
  0xb9   :  { %v309_v25 = vpop.f32.mrf.mxu3 }
  0xbb   :  { %v377_v26 = vpop.f32.mrf.mxu2  ;;  %v282_v28 = vpop.f32.mrf.mxu0 }
  0xbc   :  { %v418_v27 = vpack.c.bf16 %v377_v26, %v377_v26  ;;  %v331_v29 = vpop.f32.mrf.mxu1 }
  0xbd   :  { %v419_v30 = vpack.c.bf16 %v331_v29, %v282_v28 }
  0xbe   :  { %450 = vst [vmem:[#allocation7 + $0x14] sm:$0xf] %v418_v27 }
  0xbf   :  { %451 = vst [vmem:[#allocation7 + $0x18] sm:$0xff] %v419_v30 }
  0xc1   :  { %v312_v31 = vpop.f32.mrf.mxu3 }
  0xc3   :  { %v380_v32 = vpop.f32.mrf.mxu2  ;;  %v284_v34 = vpop.f32.mrf.mxu0 }
  0xc4   :  { %v420_v33 = vpack.c.bf16 %v380_v32, %v380_v32  ;;  %v333_v35 = vpop.f32.mrf.mxu1 }
  0xc5   :  { %v421_v36 = vpack.c.bf16 %v333_v35, %v284_v34 }
  0xc6   :  { %452 = vst [vmem:[#allocation7 + $0x20] sm:$0xf] %v420_v33 }
  0xc7   :  { %453 = vst [vmem:[#allocation7 + $0x24] sm:$0xff] %v421_v36 }
  0xc9   :  { %v314_v37 = vpop.f32.mrf.mxu3 }
  0xcb   :  { %v382_v38 = vpop.f32.mrf.mxu2  ;;  %v287_v40 = vpop.f32.mrf.mxu0 }
  0xcc   :  { %v422_v39 = vpack.c.bf16 %v382_v38, %v382_v38  ;;  %v336_v41 = vpop.f32.mrf.mxu1 }
  0xcd   :  { %v423_v42 = vpack.c.bf16 %v336_v41, %v287_v40 }
  0xce   :  { %454 = vst [vmem:[#allocation7 + $0x2c] sm:$0xf] %v422_v39 }
  0xcf   :  { %455 = vst [vmem:[#allocation7 + $0x30] sm:$0xff] %v423_v42 }
  0xd1   :  { %v356_v43 = vpop.f32.mrf.mxu3 }
  0xd2   :  { %v439_v44 = vpack.c.bf16 %v356_v43, %v307_v19 }
  0xd3   :  { %v385_v45 = vpop.f32.mrf.mxu2  ;;  %v289_v47 = vpop.f32.mrf.mxu0 }
  0xd4   :  { %v424_v46 = vpack.c.bf16 %v385_v45, %v385_v45  ;;  %471 = vst [vmem:[#allocation7 + $0x90] sm:$0xff] %v439_v44  ;;  %v338_v48 = vpop.f32.mrf.mxu1 }
  0xd5   :  { %v425_v49 = vpack.c.bf16 %v338_v48, %v289_v47 }
  0xd6   :  { %456 = vst [vmem:[#allocation7 + $0x38] sm:$0xf] %v424_v46 }
  0xd7   :  { %457 = vst [vmem:[#allocation7 + $0x3c] sm:$0xff] %v425_v49 }
  0xd9   :  { %v358_v50 = vpop.f32.mrf.mxu3 }
  0xda   :  { %v441_v51 = vpack.c.bf16 %v358_v50, %v309_v25 }
  0xdb   :  { %v387_v52 = vpop.f32.mrf.mxu2  ;;  %v292_v54 = vpop.f32.mrf.mxu0 }
  0xdc   :  { %v426_v53 = vpack.c.bf16 %v387_v52, %v387_v52  ;;  %473 = vst [vmem:[#allocation7 + $0x9c] sm:$0xff] %v441_v51  ;;  %v341_v55 = vpop.f32.mrf.mxu1 }
  0xdd   :  { %v427_v56 = vpack.c.bf16 %v341_v55, %v292_v54 }
  0xde   :  { %458 = vst [vmem:[#allocation7 + $0x44] sm:$0xf] %v426_v53 }
  0xdf   :  { %459 = vst [vmem:[#allocation7 + $0x48] sm:$0xff] %v427_v56 }
  0xe1   :  { %v361_v57 = vpop.f32.mrf.mxu3 }
  0xe2   :  { %v443_v58 = vpack.c.bf16 %v361_v57, %v312_v31 }
  0xe3   :  { %v390_v59 = vpop.f32.mrf.mxu2  ;;  %v294_v61 = vpop.f32.mrf.mxu0 }
  0xe4   :  { %v428_v60 = vpack.c.bf16 %v390_v59, %v390_v59  ;;  %475 = vst [vmem:[#allocation7 + $0xa8] sm:$0xff] %v443_v58  ;;  %v343_v62 = vpop.f32.mrf.mxu1 }
  0xe5   :  { %v429_v63 = vpack.c.bf16 %v343_v62, %v294_v61 }
  0xe6   :  { %460 = vst [vmem:[#allocation7 + $0x50] sm:$0xf] %v428_v60 }
  0xe7   :  { %461 = vst [vmem:[#allocation7 + $0x54] sm:$0xff] %v429_v63 }
  0xe9   :  { %v363_v0 = vpop.f32.mrf.mxu3 }
  0xea   :  { %v445_v1 = vpack.c.bf16 %v363_v0, %v314_v37 }
  0xeb   :  { %v392_v2 = vpop.f32.mrf.mxu2  ;;  %v297_v4 = vpop.f32.mrf.mxu0 }
  0xec   :  { %v430_v3 = vpack.c.bf16 %v392_v2, %v392_v2  ;;  %477 = vst [vmem:[#allocation7 + $0xb4] sm:$0xff] %v445_v1  ;;  %v346_v5 = vpop.f32.mrf.mxu1 }
  0xed   :  { %v431_v6 = vpack.c.bf16 %v346_v5, %v297_v4 }
  0xee   :  { %462 = vst [vmem:[#allocation7 + $0x5c] sm:$0xf] %v430_v3 }
  0xef   :  { %463 = vst [vmem:[#allocation7 + $0x60] sm:$0xff] %v431_v6 }
  0xf1   :  { %v405_v9 = vpop.f32.mrf.mxu3 }
  0xf2   :  { %v440_v11 = vpack.c.bf16 %v405_v9, %v405_v9 }
  0xf3   :  { %v395_v10 = vpop.f32.mrf.mxu2  ;;  %v299_v13 = vpop.f32.mrf.mxu0 }
  0xf4   :  { %v432_v12 = vpack.c.bf16 %v395_v10, %v395_v10  ;;  %472 = vst [vmem:[#allocation7 + $0x98] sm:$0xf] %v440_v11  ;;  %v348_v7 = vpop.f32.mrf.mxu1 }
  0xf5   :  { %v433_v14 = vpack.c.bf16 %v348_v7, %v299_v13 }
  0xf6   :  { %464 = vst [vmem:[#allocation7 + $0x68] sm:$0xf] %v432_v12 }
  0xf7   :  { %465 = vst [vmem:[#allocation7 + $0x6c] sm:$0xff] %v433_v14 }
  0xf9   :  { %v407_v8 = vpop.f32.mrf.mxu3 }
  0xfa   :  { %v442_v16 = vpack.c.bf16 %v407_v8, %v407_v8 }
  0xfb   :  { %v397_v15 = vpop.f32.mrf.mxu2  ;;  %v302_v18 = vpop.f32.mrf.mxu0 }
  0xfc   :  { %v434_v17 = vpack.c.bf16 %v397_v15, %v397_v15  ;;  %474 = vst [vmem:[#allocation7 + $0xa4] sm:$0xf] %v442_v16  ;;  %v351_v19 = vpop.f32.mrf.mxu1 }
  0xfd   :  { %v435_v20 = vpack.c.bf16 %v351_v19, %v302_v18 }
  0xfe   :  { %466 = vst [vmem:[#allocation7 + $0x74] sm:$0xf] %v434_v17 }
  0xff   :  { %467 = vst [vmem:[#allocation7 + $0x78] sm:$0xff] %v435_v20 }
 0x101   :  { %v410_v21 = vpop.f32.mrf.mxu3 }
 0x102   :  { %v444_v23 = vpack.c.bf16 %v410_v21, %v410_v21 }
 0x103   :  { %v400_v22 = vpop.f32.mrf.mxu2  ;;  %v304_v25 = vpop.f32.mrf.mxu0 }
 0x104   :  { %v436_v24 = vpack.c.bf16 %v400_v22, %v400_v22  ;;  %476 = vst [vmem:[#allocation7 + $0xb0] sm:$0xf] %v444_v23  ;;  %v353_v26 = vpop.f32.mrf.mxu1 }
 0x105   :  { %v437_v27 = vpack.c.bf16 %v353_v26, %v304_v25 }
 0x106   :  { %468 = vst [vmem:[#allocation7 + $0x80] sm:$0xf] %v436_v24 }
 0x107   :  { %469 = vst [vmem:[#allocation7 + $0x84] sm:$0xff] %v437_v27 }
 0x109   :  { %v412_v28 = vpop.f32.mrf.mxu3 }
 0x10a   :  { %v446_v30 = vpack.c.bf16 %v412_v28, %v412_v28 }
 0x10b   :  { %v402_v29 = vpop.f32.mrf.mxu2 }
 0x10c   :  { %v438_v31 = vpack.c.bf16 %v402_v29, %v402_v29  ;;  %478 = vst [vmem:[#allocation7 + $0xbc] sm:$0xf] %v446_v30 }
 0x10e   :  { %470 = vst [vmem:[#allocation7 + $0x8c] sm:$0xf] %v438_v31 }
 0x10f   :  { %491 = dma.vmem_to_hbm [thread:$0]  %s484_s1, 3072, %s486_s25, [#allocation4], %s772_s21, %s772_s21, %s773_s22  }
 0x110   :  { %766 = dma.done.wait [#allocation4], 3072  }
 0x111   :  { %767 = vsyncadd [#allocation4], 4294964224 }
 0x112   :  { %496 = vsyncpa [#allocation3], 1 }
 0x113   :  { %497 = vsyncpa [#allocation6], 1 }
 0x114   :  { %498 = vsyncpa [#allocation4], 1 }

</bundles_post_ra>
